<compile_context>
chip_gen: v7x
topology: tpu7x:2x2x1
jax: 0.10.0
libtpu: 0.0.40
codegen_flags: <defaults>
</compile_context>

<pallas_src>
import functools

import jax
import jax.numpy as jnp
from jax.experimental import pallas as pl
from jax.experimental.pallas import tpu as pltpu


LANE = 128      # pad every feature dim to a multiple of the lane width
SUBLANE = 8


def _round_up(n, m):
    return ((n + m - 1) // m) * m


def _pad2d(a, rows, cols):
    return jnp.pad(a, ((0, rows - a.shape[0]), (0, cols - a.shape[1])))


def _vmem_capacity_bytes():
    try:
        return int(getattr(pltpu.get_tpu_info(), "vmem_capacity_bytes",
                           64 << 20))
    except Exception:
        return 64 << 20     # conservative: v7x physical VMEM per TensorCore


# ----------------------------------------------------------------------------
# Fused MLP kernel (batch-tiled grid, resident bf16 weights)
# ----------------------------------------------------------------------------
def _mlp_kernel(num_layers, x_ref, *refs):
    """refs = (w0, b0, w1, b1, ..., out_ref); weights bf16, biases f32."""
    out_ref = refs[-1]
    h = x_ref[...]                                    # (TB, D0) bf16 tile
    for i in range(num_layers):
        w_ref = refs[2 * i]
        b_ref = refs[2 * i + 1]
        # bf16 operands on the MXU, f32 accumulation; keep the bias/ReLU
        # epilogue in f32 (portable to v5e, which has no bf16 VPU).
        h = jnp.dot(h.astype(jnp.bfloat16), w_ref[...],
                    preferred_element_type=jnp.float32) + b_ref[...]
        if i < num_layers - 1:                        # layers[:-1] -> no last ReLU
            h = jnp.maximum(h, 0.0)
    out_ref[...] = h


def mlp_forward(x, weights, biases):
    """x: (B, Din). weights[i]: (in_pad, out_pad) bf16, biases[i]: (1, out_pad) f32.

    Returns the lane/batch-padded output (B_pad, out_pad); the caller slices.
    """
    B = x.shape[0]
    num_layers = len(weights)
    D0 = weights[0].shape[0]
    DL = weights[-1].shape[1]

    # Batch tile: multiple of 16 (bf16 sublane packing) and chosen so that
    # mid/large batches give >= 2 grid steps for v7x megacore sharding.
    TB = min(128, _round_up(max((B + 1) // 2, 1), 16))
    B_pad = _round_up(B, TB)
    x_p = _pad2d(x.astype(jnp.float32), B_pad, D0).astype(jnp.bfloat16)

    flat_params = []
    for w, b in zip(weights, biases):
        flat_params += [w, b]

    # VMEM budget: resident params (ideally single-buffered) + double-buffered
    # bf16 x / f32 out tiles + intermediate activations, with 2x slack, capped
    # at ~75% of this chip's physical VMEM (48 MiB on v7x, 96 MiB on v5e/v6e).
    param_bytes = sum(p.size * p.dtype.itemsize for p in flat_params)
    max_n = max(w.shape[1] for w in weights)
    need = (param_bytes
            + 2 * TB * D0 * 2            # double-buffered bf16 x tiles
            + 2 * TB * DL * 4            # double-buffered f32 out tiles
            + 4 * TB * max_n * 4)        # activations / compiler headroom
    vmem_cap = _vmem_capacity_bytes()
    vmem_limit = int(min(int(0.75 * vmem_cap), max(32 << 20, 2 * need)))
    # TODO(synk): if param_bytes ever approaches ~0.6 * vmem_cap, stream the
    # weights per layer with pltpu.emit_pipeline instead of keeping them
    # resident.

    flops = 2 * B_pad * sum(w.shape[0] * w.shape[1] for w in weights)
    bytes_accessed = x_p.size * 2 + B_pad * DL * 4 + param_bytes
    kernel = functools.partial(_mlp_kernel, num_layers)

    def build_and_call(single_buffer_params):
        in_specs = [pl.BlockSpec((TB, D0), lambda i: (i, 0))]
        for w, b in zip(weights, biases):
            if single_buffer_params:
                # Constant index_map -> the block never changes; a single VMEM
                # buffer halves the resident-parameter footprint.
                in_specs.append(pl.BlockSpec(w.shape, lambda i: (0, 0),
                                             pipeline_mode=pl.Buffered(1)))
                in_specs.append(pl.BlockSpec(b.shape, lambda i: (0, 0),
                                             pipeline_mode=pl.Buffered(1)))
            else:
                in_specs.append(pl.BlockSpec(w.shape, lambda i: (0, 0)))
                in_specs.append(pl.BlockSpec(b.shape, lambda i: (0, 0)))
        out_specs = pl.BlockSpec((TB, DL), lambda i: (i, 0))
        return pl.pallas_call(
            kernel,
            out_shape=jax.ShapeDtypeStruct((B_pad, DL), jnp.float32),
            grid=(B_pad // TB,),
            in_specs=in_specs,
            out_specs=out_specs,
            compiler_params=pltpu.CompilerParams(
                dimension_semantics=("parallel",),   # shard batch across TCs
                vmem_limit_bytes=vmem_limit),
            cost_estimate=pl.CostEstimate(flops=flops, transcendentals=0,
                                          bytes_accessed=bytes_accessed),
        )(x_p, *flat_params)

    try:
        return build_and_call(True)
    except Exception:
        # pl.Buffered(1) not supported by this jax/Mosaic version -> default
        # double-buffered params (correct, just a larger VMEM footprint).
        return build_and_call(False)


# ----------------------------------------------------------------------------
# Weighted embedding-bag kernel (batched gather via data-dependent DMA)
# ----------------------------------------------------------------------------
def _emb_bag_kernel(bag_len, tile_b, idx_ref, emb_hbm, w_ref, out_ref,
                    buf, sem):
    """out[r, :] = sum_j emb[idx[r, j], :] * w[r, j] for one tile of rows.

    idx_ref : SMEM (B_pad * L,) int32  (scalar prefetch, flattened 1-D)
    emb_hbm : HBM  (V, Dp) f32         (memory_space=pl.ANY)
    w_ref   : VMEM (TB, L) f32         bag weights for this tile
    out_ref : VMEM (TB, Dp) f32
    buf     : VMEM (L, TB, Dp) f32 gather buffer
    sem     : DMA semaphores, one per bag position
    """
    t = pl.program_id(0)
    base = t * (tile_b * bag_len)

    # Issue every row gather of this tile up front so the DMA engine has
    # TB*L copies in flight instead of one serialized 512 B copy at a time.
    @pl.loop(0, tile_b)
    def _(r):
        for j in range(bag_len):                       # small static unroll
            row = idx_ref[base + r * bag_len + j]      # scalar read from SMEM
            pltpu.make_async_copy(
                emb_hbm.at[pl.ds(row, 1), :],
                buf.at[j, pl.ds(r, 1), :],
                sem.at[j],
            ).start()

    # Weighted sum, vectorized over the whole (TB, Dp) tile; waiting per bag
    # position lets later DMAs keep overlapping with earlier compute.
    acc = jnp.zeros(out_ref.shape, jnp.float32)
    for j in range(bag_len):
        @pl.loop(0, tile_b)
        def _(r, j=j):                                 # consume TB completions
            pltpu.make_async_copy(
                emb_hbm.at[pl.ds(0, 1), :],
                buf.at[j, pl.ds(0, 1), :],
                sem.at[j],
            ).wait()
        acc = acc + buf[j] * w_ref[:, pl.ds(j, 1)]
    out_ref[...] = acc                                 # single unmasked store


def embedding_bag_forward(idx, bag_w, emb_pad):
    """idx, bag_w: (B, L); emb_pad: (V, D_pad) f32, kept HBM-resident."""
    B, L = idx.shape
    _, Dp = emb_pad.shape
    TB = min(64, _round_up(B, SUBLANE))
    B_pad = _round_up(B, TB)
    # Padding rows use index 0 with weight 0 (row 0 is the zero padding row),
    # so they contribute nothing and are sliced off below.  idx is flattened
    # to 1-D so the SMEM copy is not lane-padded to 128 columns.
    idx_flat = jnp.pad(idx.astype(jnp.int32),
                       ((0, B_pad - B), (0, 0))).reshape(-1)
    w_p = jnp.pad(bag_w.astype(jnp.float32), ((0, B_pad - B), (0, 0)))

    kernel = functools.partial(_emb_bag_kernel, L, TB)
    out = pl.pallas_call(
        kernel,
        out_shape=jax.ShapeDtypeStruct((B_pad, Dp), jnp.float32),
        grid_spec=pltpu.PrefetchScalarGridSpec(
            num_scalar_prefetch=1,                     # flattened idx -> SMEM
            grid=(B_pad // TB,),
            in_specs=[pl.BlockSpec(memory_space=pl.ANY),              # table
                      pl.BlockSpec((TB, L), lambda t, idx_r: (t, 0))],  # bag w
            out_specs=pl.BlockSpec((TB, Dp), lambda t, idx_r: (t, 0)),
            scratch_shapes=[pltpu.VMEM((L, TB, Dp), jnp.float32),
                            pltpu.SemaphoreType.DMA((L,))]),
        compiler_params=pltpu.CompilerParams(
            dimension_semantics=("parallel",)),
        cost_estimate=pl.CostEstimate(
            flops=2 * B_pad * L * Dp, transcendentals=0,
            bytes_accessed=B_pad * L * (Dp * 4 + 8) + B_pad * Dp * 4),
    )(idx_flat, emb_pad, w_p)
    return out[:B]


# ----------------------------------------------------------------------------
# FCN module (parameter construction + forward dispatch)
# ----------------------------------------------------------------------------
class FCN:
    def __init__(self, arch, sparse, key):
        self.sparse = sparse
        self.dense = not sparse
        lens = [int(i) for i in arch.split("-")]

        if self.dense:
            dims = list(zip(lens[:-1], lens[1:]))
        else:
            vocab, emb_dim = lens[0], lens[1]
            key, ek = jax.random.split(key)
            emb = jax.random.normal(ek, (vocab, emb_dim), jnp.float32)
            emb = emb.at[0].set(0.0)                  # padding_idx=0 -> zero row
            self.embedding = emb                      # f32 reference copy
            self.embedding_pad = _pad2d(emb, vocab, _round_up(emb_dim, LANE))
            dims = list(zip(lens[1:-1], lens[2:]))

        self.out_dim = dims[-1][1]
        # f32 unpadded copies for the pure-JAX reference; lane-padded bf16
        # weights / f32 biases for the kernels (zero padding is exact for a
        # ReLU MLP).
        self.weights, self.biases = [], []
        self.weights_pad, self.biases_pad = [], []
        for fan_in, fan_out in dims:
            key, wk, bk = jax.random.split(key, 3)
            bound = 1.0 / (fan_in ** 0.5)             # nn.Linear default init
            w = jax.random.uniform(wk, (fan_in, fan_out), jnp.float32,
                                   -bound, bound)     # stored (in, out)
            b = jax.random.uniform(bk, (1, fan_out), jnp.float32, -bound, bound)
            self.weights.append(w)
            self.biases.append(b)
            self.weights_pad.append(
                _pad2d(w, _round_up(fan_in, LANE),
                       _round_up(fan_out, LANE)).astype(jnp.bfloat16))
            self.biases_pad.append(_pad2d(b, 1, _round_up(fan_out, LANE)))

    def __call__(self, x, w=None):
        if self.dense:
            h = x
        else:
            h = embedding_bag_forward(x, w, self.embedding_pad)
        out = mlp_forward(h, self.weights_pad, self.biases_pad)
        return out[:x.shape[0], :self.out_dim]


# ----------------------------------------------------------------------------
# Pure-JAX references (for correctness check)
# ----------------------------------------------------------------------------
def _ref_mlp(x, weights, biases, bf16_operands=False):
    h = x
    for i, (w, b) in enumerate(zip(weights, biases)):
        if bf16_operands:   # mimic the kernel's bf16-MXU / f32-accumulate math
            h = jnp.dot(h.astype(jnp.bfloat16), w.astype(jnp.bfloat16),
                        preferred_element_type=jnp.float32) + b
        else:
            h = h @ w + b
        if i < len(weights) - 1:
            h = jnp.maximum(h, 0.0)
    return h


def _ref_emb_bag(idx, w, emb):
    return jnp.sum(emb[idx] * w[:, :, None], axis=1)


if __name__ == "__main__":
    key = jax.random.PRNGKey(0)
    k_md, k_ms, k_x, k_idx, k_w = jax.random.split(key, 5)

    # ---- dense mode: arch "16-32-32-8", batch 4 ----
    model_d = FCN("16-32-32-8", sparse=False, key=k_md)
    x_dense = jax.random.normal(k_x, (4, 16), jnp.float32)
    out_d = jax.block_until_ready(model_d(x_dense))
    assert out_d.shape == (4, 8)
    # tight check vs. a reference using the same bf16-operand MXU numerics
    ref_d_mxu = _ref_mlp(x_dense, model_d.weights, model_d.biases,
                         bf16_operands=True)
    assert jnp.allclose(out_d, ref_d_mxu, atol=2e-3, rtol=2e-3)
    # loose check vs. the full-f32 PyTorch-equivalent math (bf16 MXU operands)
    ref_d_f32 = _ref_mlp(x_dense, model_d.weights, model_d.biases)
    assert jnp.allclose(out_d, ref_d_f32, atol=6e-2, rtol=6e-2)

    # ---- sparse mode: arch "50-16-32-8" (vocab=50, emb_dim=16), bag len 6 ----
    model_s = FCN("50-16-32-8", sparse=True, key=k_ms)
    x_idx = jax.random.randint(k_idx, (4, 6), 0, 50, jnp.int32)
    w_sp = jax.random.uniform(k_w, (4, 6), jnp.float32)
    out_s = jax.block_until_ready(model_s(x_idx, w_sp))
    assert out_s.shape == (4, 8)
    emb_ref = _ref_emb_bag(x_idx, w_sp, model_s.embedding)
    ref_s_mxu = _ref_mlp(emb_ref, model_s.weights, model_s.biases,
                         bf16_operands=True)
    assert jnp.allclose(out_s, ref_s_mxu, atol=2e-3, rtol=2e-3)
    ref_s_f32 = _ref_mlp(emb_ref, model_s.weights, model_s.biases)
    assert jnp.allclose(out_s, ref_s_f32, atol=6e-2, rtol=6e-2)

    print("KERNEL_OK")
</pallas_src>

<mosaic_0001>
module attributes {stable_mosaic.version = 11 : i64} {
  func.func @_mlp_kernel(%arg0: i32, %arg1: memref<16x128xbf16, #tpu.memory_space<vmem>>, %arg2: memref<128x128xbf16, #tpu.memory_space<vmem>>, %arg3: memref<1x128xf32, #tpu.memory_space<vmem>>, %arg4: memref<128x128xbf16, #tpu.memory_space<vmem>>, %arg5: memref<1x128xf32, #tpu.memory_space<vmem>>, %arg6: memref<128x128xbf16, #tpu.memory_space<vmem>>, %arg7: memref<1x128xf32, #tpu.memory_space<vmem>>, %arg8: memref<16x128xf32, #tpu.memory_space<vmem>>) attributes {dimension_semantics = [#tpu.dimension_semantics<parallel>], iteration_bounds = array<i64: 1>, scalar_prefetch = 0 : i64, scratch_operands = 0 : i64, tpu.core_type = #tpu.core_type<tc>, window_params = [{transform_indices = @transform_0, window_bounds = array<i64: 16, 128>}, {pipeline_mode = #tpu.pipeline_mode<synchronous>, transform_indices = @transform_1, window_bounds = array<i64: 128, 128>}, {pipeline_mode = #tpu.pipeline_mode<synchronous>, transform_indices = @transform_2, window_bounds = array<i64: 1, 128>}, {pipeline_mode = #tpu.pipeline_mode<synchronous>, transform_indices = @transform_3, window_bounds = array<i64: 128, 128>}, {pipeline_mode = #tpu.pipeline_mode<synchronous>, transform_indices = @transform_4, window_bounds = array<i64: 1, 128>}, {pipeline_mode = #tpu.pipeline_mode<synchronous>, transform_indices = @transform_5, window_bounds = array<i64: 128, 128>}, {pipeline_mode = #tpu.pipeline_mode<synchronous>, transform_indices = @transform_6, window_bounds = array<i64: 1, 128>}, {transform_indices = @transform_7, window_bounds = array<i64: 16, 128>}]} {
    %c0 = arith.constant 0 : index
    %c0_0 = arith.constant 0 : index
    %0 = vector.load %arg1[%c0, %c0_0] : memref<16x128xbf16, #tpu.memory_space<vmem>>, vector<16x128xbf16>
    %c0_1 = arith.constant 0 : index
    %c0_2 = arith.constant 0 : index
    %1 = vector.load %arg2[%c0_1, %c0_2] : memref<128x128xbf16, #tpu.memory_space<vmem>>, vector<128x128xbf16>
    %cst = arith.constant dense<0.000000e+00> : vector<16x128xf32>
    %2 = tpu.matmul %0, %1, %cst {dimension_numbers = #tpu.dot_dimension_numbers<[1], [0], [0], [1], [0, 0, 1, 1], [], []>} : vector<16x128xbf16>, vector<128x128xbf16>, vector<16x128xf32> -> vector<16x128xf32>
    %c0_3 = arith.constant 0 : index
    %c0_4 = arith.constant 0 : index
    %3 = vector.load %arg3[%c0_3, %c0_4] : memref<1x128xf32, #tpu.memory_space<vmem>>, vector<1x128xf32>
    %4 = vector.broadcast %3 : vector<1x128xf32> to vector<16x128xf32>
    %5 = arith.addf %2, %4 : vector<16x128xf32>
    %cst_5 = arith.constant 0.000000e+00 : f32
    %6 = vector.broadcast %cst_5 : f32 to vector<16x128xf32>
    %7 = arith.maximumf %5, %6 : vector<16x128xf32>
    %8 = arith.truncf %7 : vector<16x128xf32> to vector<16x128xbf16>
    %c0_6 = arith.constant 0 : index
    %c0_7 = arith.constant 0 : index
    %9 = vector.load %arg4[%c0_6, %c0_7] : memref<128x128xbf16, #tpu.memory_space<vmem>>, vector<128x128xbf16>
    %cst_8 = arith.constant dense<0.000000e+00> : vector<16x128xf32>
    %10 = tpu.matmul %8, %9, %cst_8 {dimension_numbers = #tpu.dot_dimension_numbers<[1], [0], [0], [1], [0, 0, 1, 1], [], []>} : vector<16x128xbf16>, vector<128x128xbf16>, vector<16x128xf32> -> vector<16x128xf32>
    %c0_9 = arith.constant 0 : index
    %c0_10 = arith.constant 0 : index
    %11 = vector.load %arg5[%c0_9, %c0_10] : memref<1x128xf32, #tpu.memory_space<vmem>>, vector<1x128xf32>
    %12 = vector.broadcast %11 : vector<1x128xf32> to vector<16x128xf32>
    %13 = arith.addf %10, %12 : vector<16x128xf32>
    %cst_11 = arith.constant 0.000000e+00 : f32
    %14 = vector.broadcast %cst_11 : f32 to vector<16x128xf32>
    %15 = arith.maximumf %13, %14 : vector<16x128xf32>
    %16 = arith.truncf %15 : vector<16x128xf32> to vector<16x128xbf16>
    %c0_12 = arith.constant 0 : index
    %c0_13 = arith.constant 0 : index
    %17 = vector.load %arg6[%c0_12, %c0_13] : memref<128x128xbf16, #tpu.memory_space<vmem>>, vector<128x128xbf16>
    %cst_14 = arith.constant dense<0.000000e+00> : vector<16x128xf32>
    %18 = tpu.matmul %16, %17, %cst_14 {dimension_numbers = #tpu.dot_dimension_numbers<[1], [0], [0], [1], [0, 0, 1, 1], [], []>} : vector<16x128xbf16>, vector<128x128xbf16>, vector<16x128xf32> -> vector<16x128xf32>
    %c0_15 = arith.constant 0 : index
    %c0_16 = arith.constant 0 : index
    %19 = vector.load %arg7[%c0_15, %c0_16] : memref<1x128xf32, #tpu.memory_space<vmem>>, vector<1x128xf32>
    %20 = vector.broadcast %19 : vector<1x128xf32> to vector<16x128xf32>
    %21 = arith.addf %18, %20 : vector<16x128xf32>
    %c0_17 = arith.constant 0 : index
    %c0_18 = arith.constant 0 : index
    %22 = vector.load %arg8[%c0_17, %c0_18] : memref<16x128xf32, #tpu.memory_space<vmem>>, vector<16x128xf32>
    tpu.vector_store %arg8[%c0_17, %c0_18], %21 {strides = array<i32>} : memref<16x128xf32, #tpu.memory_space<vmem>>, vector<16x128xf32>,
    return
  }
  func.func @transform_0(%arg0: i32) -> (i32, i32) {
    %c0_i32 = arith.constant 0 : i32
    %c0_i32_0 = arith.constant 0 : i32
    return %arg0, %c0_i32 : i32, i32
  }
  func.func @transform_1(%arg0: i32) -> (i32, i32) {
    %c0_i32 = arith.constant 0 : i32
    %c0_i32_0 = arith.constant 0 : i32
    %c0_i32_1 = arith.constant 0 : i32
    return %c0_i32, %c0_i32_0 : i32, i32
  }
  func.func @transform_2(%arg0: i32) -> (i32, i32) {
    %c0_i32 = arith.constant 0 : i32
    %c0_i32_0 = arith.constant 0 : i32
    %c0_i32_1 = arith.constant 0 : i32
    return %c0_i32, %c0_i32_0 : i32, i32
  }
  func.func @transform_3(%arg0: i32) -> (i32, i32) {
    %c0_i32 = arith.constant 0 : i32
    %c0_i32_0 = arith.constant 0 : i32
    %c0_i32_1 = arith.constant 0 : i32
    return %c0_i32, %c0_i32_0 : i32, i32
  }
  func.func @transform_4(%arg0: i32) -> (i32, i32) {
    %c0_i32 = arith.constant 0 : i32
    %c0_i32_0 = arith.constant 0 : i32
    %c0_i32_1 = arith.constant 0 : i32
    return %c0_i32, %c0_i32_0 : i32, i32
  }
  func.func @transform_5(%arg0: i32) -> (i32, i32) {
    %c0_i32 = arith.constant 0 : i32
    %c0_i32_0 = arith.constant 0 : i32
    %c0_i32_1 = arith.constant 0 : i32
    return %c0_i32, %c0_i32_0 : i32, i32
  }
  func.func @transform_6(%arg0: i32) -> (i32, i32) {
    %c0_i32 = arith.constant 0 : i32
    %c0_i32_0 = arith.constant 0 : i32
    %c0_i32_1 = arith.constant 0 : i32
    return %c0_i32, %c0_i32_0 : i32, i32
  }
  func.func @transform_7(%arg0: i32) -> (i32, i32) {
    %c0_i32 = arith.constant 0 : i32
    %c0_i32_0 = arith.constant 0 : i32
    return %arg0, %c0_i32 : i32, i32
  }
}

module attributes {stable_mosaic.version = 11 : i64} {
  func.func @_mlp_kernel(%arg0: i32, %arg1: memref<16x128xbf16, #tpu.memory_space<vmem>>, %arg2: memref<128x128xbf16, #tpu.memory_space<vmem>>, %arg3: memref<1x128xf32, #tpu.memory_space<vmem>>, %arg4: memref<128x128xbf16, #tpu.memory_space<vmem>>, %arg5: memref<1x128xf32, #tpu.memory_space<vmem>>, %arg6: memref<128x128xbf16, #tpu.memory_space<vmem>>, %arg7: memref<1x128xf32, #tpu.memory_space<vmem>>, %arg8: memref<16x128xf32, #tpu.memory_space<vmem>>) attributes {dimension_semantics = [#tpu.dimension_semantics<parallel>], iteration_bounds = array<i64: 1>, scalar_prefetch = 0 : i64, scratch_operands = 0 : i64, tpu.core_type = #tpu.core_type<tc>, window_params = [{transform_indices = @transform_0, window_bounds = array<i64: 16, 128>}, {pipeline_mode = #tpu.pipeline_mode<synchronous>, transform_indices = @transform_1, window_bounds = array<i64: 128, 128>}, {pipeline_mode = #tpu.pipeline_mode<synchronous>, transform_indices = @transform_2, window_bounds = array<i64: 1, 128>}, {pipeline_mode = #tpu.pipeline_mode<synchronous>, transform_indices = @transform_3, window_bounds = array<i64: 128, 128>}, {pipeline_mode = #tpu.pipeline_mode<synchronous>, transform_indices = @transform_4, window_bounds = array<i64: 1, 128>}, {pipeline_mode = #tpu.pipeline_mode<synchronous>, transform_indices = @transform_5, window_bounds = array<i64: 128, 128>}, {pipeline_mode = #tpu.pipeline_mode<synchronous>, transform_indices = @transform_6, window_bounds = array<i64: 1, 128>}, {transform_indices = @transform_7, window_bounds = array<i64: 16, 128>}]} {
    %c0 = arith.constant 0 : index
    %c0_0 = arith.constant 0 : index
    %0 = vector.load %arg1[%c0, %c0_0] : memref<16x128xbf16, #tpu.memory_space<vmem>>, vector<16x128xbf16>
    %c0_1 = arith.constant 0 : index
    %c0_2 = arith.constant 0 : index
    %1 = vector.load %arg2[%c0_1, %c0_2] : memref<128x128xbf16, #tpu.memory_space<vmem>>, vector<128x128xbf16>
    %cst = arith.constant dense<0.000000e+00> : vector<16x128xf32>
    %2 = tpu.matmul %0, %1, %cst {dimension_numbers = #tpu.dot_dimension_numbers<[1], [0], [0], [1], [0, 0, 1, 1], [], []>} : vector<16x128xbf16>, vector<128x128xbf16>, vector<16x128xf32> -> vector<16x128xf32>
    %c0_3 = arith.constant 0 : index
    %c0_4 = arith.constant 0 : index
    %3 = vector.load %arg3[%c0_3, %c0_4] : memref<1x128xf32, #tpu.memory_space<vmem>>, vector<1x128xf32>
    %4 = vector.broadcast %3 : vector<1x128xf32> to vector<16x128xf32>
    %5 = arith.addf %2, %4 : vector<16x128xf32>
    %cst_5 = arith.constant 0.000000e+00 : f32
    %6 = vector.broadcast %cst_5 : f32 to vector<16x128xf32>
    %7 = arith.maximumf %5, %6 : vector<16x128xf32>
    %8 = arith.truncf %7 : vector<16x128xf32> to vector<16x128xbf16>
    %c0_6 = arith.constant 0 : index
    %c0_7 = arith.constant 0 : index
    %9 = vector.load %arg4[%c0_6, %c0_7] : memref<128x128xbf16, #tpu.memory_space<vmem>>, vector<128x128xbf16>
    %cst_8 = arith.constant dense<0.000000e+00> : vector<16x128xf32>
    %10 = tpu.matmul %8, %9, %cst_8 {dimension_numbers = #tpu.dot_dimension_numbers<[1], [0], [0], [1], [0, 0, 1, 1], [], []>} : vector<16x128xbf16>, vector<128x128xbf16>, vector<16x128xf32> -> vector<16x128xf32>
    %c0_9 = arith.constant 0 : index
    %c0_10 = arith.constant 0 : index
    %11 = vector.load %arg5[%c0_9, %c0_10] : memref<1x128xf32, #tpu.memory_space<vmem>>, vector<1x128xf32>
    %12 = vector.broadcast %11 : vector<1x128xf32> to vector<16x128xf32>
    %13 = arith.addf %10, %12 : vector<16x128xf32>
    %cst_11 = arith.constant 0.000000e+00 : f32
    %14 = vector.broadcast %cst_11 : f32 to vector<16x128xf32>
    %15 = arith.maximumf %13, %14 : vector<16x128xf32>
    %16 = arith.truncf %15 : vector<16x128xf32> to vector<16x128xbf16>
    %c0_12 = arith.constant 0 : index
    %c0_13 = arith.constant 0 : index
    %17 = vector.load %arg6[%c0_12, %c0_13] : memref<128x128xbf16, #tpu.memory_space<vmem>>, vector<128x128xbf16>
    %cst_14 = arith.constant dense<0.000000e+00> : vector<16x128xf32>
    %18 = tpu.matmul %16, %17, %cst_14 {dimension_numbers = #tpu.dot_dimension_numbers<[1], [0], [0], [1], [0, 0, 1, 1], [], []>} : vector<16x128xbf16>, vector<128x128xbf16>, vector<16x128xf32> -> vector<16x128xf32>
    %c0_15 = arith.constant 0 : index
    %c0_16 = arith.constant 0 : index
    %19 = vector.load %arg7[%c0_15, %c0_16] : memref<1x128xf32, #tpu.memory_space<vmem>>, vector<1x128xf32>
    %20 = vector.broadcast %19 : vector<1x128xf32> to vector<16x128xf32>
    %21 = arith.addf %18, %20 : vector<16x128xf32>
    %c0_17 = arith.constant 0 : index
    %c0_18 = arith.constant 0 : index
    %22 = vector.load %arg8[%c0_17, %c0_18] : memref<16x128xf32, #tpu.memory_space<vmem>>, vector<16x128xf32>
    tpu.vector_store %arg8[%c0_17, %c0_18], %21 {strides = array<i32>} : memref<16x128xf32, #tpu.memory_space<vmem>>, vector<16x128xf32>,
    return
  }
  func.func @transform_0(%arg0: i32) -> (i32, i32) {
    %c0_i32 = arith.constant 0 : i32
    %c0_i32_0 = arith.constant 0 : i32
    return %arg0, %c0_i32 : i32, i32
  }
  func.func @transform_1(%arg0: i32) -> (i32, i32) {
    %c0_i32 = arith.constant 0 : i32
    %c0_i32_0 = arith.constant 0 : i32
    %c0_i32_1 = arith.constant 0 : i32
    return %c0_i32, %c0_i32_0 : i32, i32
  }
  func.func @transform_2(%arg0: i32) -> (i32, i32) {
    %c0_i32 = arith.constant 0 : i32
    %c0_i32_0 = arith.constant 0 : i32
    %c0_i32_1 = arith.constant 0 : i32
    return %c0_i32, %c0_i32_0 : i32, i32
  }
  func.func @transform_3(%arg0: i32) -> (i32, i32) {
    %c0_i32 = arith.constant 0 : i32
    %c0_i32_0 = arith.constant 0 : i32
    %c0_i32_1 = arith.constant 0 : i32
    return %c0_i32, %c0_i32_0 : i32, i32
  }
  func.func @transform_4(%arg0: i32) -> (i32, i32) {
    %c0_i32 = arith.constant 0 : i32
    %c0_i32_0 = arith.constant 0 : i32
    %c0_i32_1 = arith.constant 0 : i32
    return %c0_i32, %c0_i32_0 : i32, i32
  }
  func.func @transform_5(%arg0: i32) -> (i32, i32) {
    %c0_i32 = arith.constant 0 : i32
    %c0_i32_0 = arith.constant 0 : i32
    %c0_i32_1 = arith.constant 0 : i32
    return %c0_i32, %c0_i32_0 : i32, i32
  }
  func.func @transform_6(%arg0: i32) -> (i32, i32) {
    %c0_i32 = arith.constant 0 : i32
    %c0_i32_0 = arith.constant 0 : i32
    %c0_i32_1 = arith.constant 0 : i32
    return %c0_i32, %c0_i32_0 : i32, i32
  }
  func.func @transform_7(%arg0: i32) -> (i32, i32) {
    %c0_i32 = arith.constant 0 : i32
    %c0_i32_0 = arith.constant 0 : i32
    return %arg0, %c0_i32 : i32, i32
  }
}

</mosaic_0001>

<bundles_post_ra>
// kernel: tpu_custom_call.1
= control target key start
LH: loop header
LB: loop body
LE: loop exit
PB: predicated region body
PF: predicated region fallthrough
CT: control target
= control target key end

     0   :  { %12 = vsyncpa [#allocation3], 0  ;;  %s899_s0 = inlined_call_operand.hbm [shape: bf16[16,128], index: 0, kind: input, shape index: {}]   ;;  %s900_s1 = inlined_call_operand.hbm [shape: bf16[128,128], index: 1, kind: input, shape index: {}]   ;;  %s901_s2 = inlined_call_operand.vmem [shape: f32[1,128], index: 2, kind: input, shape index: {}]   ;;  %s902_s3 = inlined_call_operand.hbm [shape: bf16[128,128], index: 3, kind: input, shape index: {}]   ;;  %s903_s4 = inlined_call_operand.vmem [shape: f32[1,128], index: 4, kind: input, shape index: {}]   ;;  %s904_s5 = inlined_call_operand.hbm [shape: bf16[128,128], index: 5, kind: input, shape index: {}]   ;;  %s905_s6 = inlined_call_operand.vmem [shape: f32[1,128], index: 6, kind: input, shape index: {}]   ;;  %s906_s7 = inlined_call_operand.hbm [shape: f32[16,128], index: 7, kind: output, shape index: {}]  }
   0x1   :  { %13 = vsyncpa [#allocation6], 0 }
   0x2   :  { %14 = vsyncpa [#allocation9], 0 }
   0x3   :  { %15 = vsyncpa [#allocation4], 0  ;;  %s723_s24 = smov [#allocation5]   ;;  %s724_s26 = smov [#allocation2]  }
   0x4   :  { %s33_s25 = sshll.u32 %s723_s24, 4  ;;  %s21_s27 = sshll.u32 %s724_s26, 4  ;;  %s34_s25 = int_to_ptr.vmem [resolvable:$true] %s33_s25  ;;  %s774_s27 = int_to_ptr.vmem [resolvable:$true] %s21_s27 }
   0x5   :  { %s605_s30 = scalar_lea.hbm %s900_s1, 1024 }
   0x6   :  { %p606_p0 = scmp.ne.s32.totalorder %s900_s1, %s605_s30  ;;  %p609_p1 = scmp.lt.u32.totalorder %s605_s30, %s900_s1 }
   0x8   :  { %p611_p2 = pnand %p609_p1, %p606_p0 }
   0xa   :  { %614 = shalt.err (!%p611_p2)
}
   0xb   :  { %s615_s12 = scalar_lea.vmem %s34_s25, 1024  ;;  %p620_p4 = scmp.lt.s32.totalorder %s34_s25, %s34_s25 }
   0xc   :  { %p616_p3 = scmp.ne.s32.totalorder %s34_s25, %s615_s12  ;;  %p621_p5 = scmp.lt.s32.totalorder %s615_s12, %s615_s12 }
   0xe   :  { %p622_p6 = por %p621_p5, %p620_p4 }
  0x10   :  { %p623_p7 = pnand %p622_p6, %p616_p3 }
  0x12   :  { %626 = shalt.err (!%p623_p7)
}
  0x13   :  { %s725_s13 = smov 64   ;;  %s726_s14 = smov 4  }
  0x14   :  { %39 = dma.hbm_to_vmem [thread:$0]  %s900_s1, 1024, %s34_s25, [#allocation6], %s725_s13, %s725_s13, %s726_s14  }
  0x15   :  { %s627_s19 = scalar_lea.hbm %s899_s0, 128 }
  0x16   :  { %p628_p8 = scmp.ne.s32.totalorder %s899_s0, %s627_s19  ;;  %p631_p9 = scmp.lt.u32.totalorder %s627_s19, %s899_s0 }
  0x18   :  { %p633_p10 = pnand %p631_p9, %p628_p8 }
  0x1a   :  { %636 = shalt.err (!%p633_p10)
}
  0x1b   :  { %s637_s24 = scalar_lea.vmem %s774_s27, 128  ;;  %p642_p12 = scmp.lt.s32.totalorder %s774_s27, %s774_s27 }
  0x1c   :  { %p638_p11 = scmp.ne.s32.totalorder %s774_s27, %s637_s24  ;;  %p643_p13 = scmp.lt.s32.totalorder %s637_s24, %s637_s24 }
  0x1e   :  { %p644_p0 = por %p643_p13, %p642_p12 }
  0x20   :  { %p645_p1 = pnand %p644_p0, %p638_p11 }
  0x22   :  { %648 = shalt.err (!%p645_p1)
}
  0x23   :  { %27 = dma.hbm_to_vmem [thread:$0]  %s899_s0, 128, %s774_s27, [#allocation3], %s725_s13, %s725_s13, %s726_s14  }
  0x24   :  { %s727_s26 = smov [#allocation7]   ;;  %s728_s29 = smov [#allocation8]  }
  0x25   :  { %s47_s28 = sshll.u32 %s727_s26, 4  ;;  %s61_s30 = sshll.u32 %s728_s29, 4  ;;  %s48_s28 = int_to_ptr.vmem [resolvable:$true] %s47_s28  ;;  %s811_s30 = int_to_ptr.vmem [resolvable:$true] %s61_s30 }
  0x26   :  { %s649_s10 = scalar_lea.hbm %s902_s3, 1024 }
  0x27   :  { %p650_p2 = scmp.ne.s32.totalorder %s902_s3, %s649_s10  ;;  %p653_p3 = scmp.lt.u32.totalorder %s649_s10, %s902_s3 }
  0x29   :  { %p655_p4 = pnand %p653_p3, %p650_p2 }
  0x2b   :  { %658 = shalt.err (!%p655_p4)
}
  0x2c   :  { %s659_s0 = scalar_lea.vmem %s48_s28, 1024  ;;  %p664_p6 = scmp.lt.s32.totalorder %s48_s28, %s48_s28 }
  0x2d   :  { %p660_p5 = scmp.ne.s32.totalorder %s48_s28, %s659_s0  ;;  %p665_p7 = scmp.lt.s32.totalorder %s659_s0, %s659_s0 }
  0x2f   :  { %p666_p8 = por %p665_p7, %p664_p6 }
  0x31   :  { %p667_p9 = pnand %p666_p8, %p660_p5 }
  0x33   :  { %670 = shalt.err (!%p667_p9)
}
  0x34   :  { %53 = dma.hbm_to_vmem [thread:$0]  %s902_s3, 1024, %s48_s28, [#allocation6], %s725_s13, %s725_s13, %s726_s14  }
  0x35   :  { %s671_s20 = scalar_lea.hbm %s904_s5, 1024 }
  0x36   :  { %p672_p10 = scmp.ne.s32.totalorder %s904_s5, %s671_s20  ;;  %p675_p11 = scmp.lt.u32.totalorder %s671_s20, %s904_s5 }
  0x38   :  { %p677_p12 = pnand %p675_p11, %p672_p10 }
  0x3a   :  { %680 = shalt.err (!%p677_p12)
}
  0x3b   :  { %s681_s1 = scalar_lea.vmem %s811_s30, 1024  ;;  %p686_p0 = scmp.lt.s32.totalorder %s811_s30, %s811_s30 }
  0x3c   :  { %p682_p13 = scmp.ne.s32.totalorder %s811_s30, %s681_s1  ;;  %p687_p1 = scmp.lt.s32.totalorder %s681_s1, %s681_s1 }
  0x3e   :  { %p688_p2 = por %p687_p1, %p686_p0 }
  0x40   :  { %p689_p3 = pnand %p688_p2, %p682_p13 }
  0x42   :  { %692 = shalt.err (!%p689_p3)
}
  0x43   :  { %67 = dma.hbm_to_vmem [thread:$0]  %s904_s5, 1024, %s811_s30, [#allocation9], %s725_s13, %s725_s13, %s726_s14  }
  0x44   :  { %715 = dma.done.wait [#allocation3], 128  }
  0x45   :  { %716 = vsyncadd [#allocation3], 4294967168 }
  0x46   :  { %717 = dma.done.wait [#allocation6], 2048  }
  0x47   :  { %718 = vsyncadd [#allocation6], 4294965248 }
  0x48   :  { %719 = dma.done.wait [#allocation9], 1024  }
  0x49   :  { %720 = vsyncadd [#allocation9], 4294966272  ;;  %v729_v0 = vmov 0.0   ;;  %vm730_vm0 = vmmov 0   ;;  %v580_v1 = vld [vmem:[#allocation5] sm:$0xff]   ;;  %v581_v2 = vld [vmem:[#allocation5 + $0x8] sm:$0xff]  }
  0x4a   :  { %509 = vmatprep.subr.bf16.mxu0 %v729_v0  ;;  %525 = vmatprep.mubr.msk.bf16.mxu0 %vm730_vm0, %v729_v0  ;;  %v582_v3 = vld [vmem:[#allocation5 + $0x10] sm:$0xff]   ;;  %v589_v4 = vld [vmem:[#allocation7] sm:$0xff]   ;;  %v583_v5 = vld [vmem:[#allocation5 + $0x18] sm:$0xff]   ;;  %s731_s29 = smov [#allocation10]  }
  0x4b   :  { %529 = vmatprep.subr.bf16.mxu1 %v729_v0  ;;  %545 = vmatprep.mubr.msk.bf16.mxu1 %vm730_vm0, %v729_v0  ;;  %v590_v6 = vld [vmem:[#allocation7 + $0x8] sm:$0xff]   ;;  %v584_v7 = vld [vmem:[#allocation5 + $0x20] sm:$0xff]   ;;  %v591_v8 = vld [vmem:[#allocation7 + $0x10] sm:$0xff]   ;;  %s440_s30 = sshll.u32 %s731_s29, 4  ;;  %s441_s30 = int_to_ptr.vmem [resolvable:$true] %s440_s30 }
  0x4c   :  { %510 = vmatpush3.bf16.msra.mxu0 %v580_v1  ;;  %530 = vmatpush3.bf16.msra.mxu1 %v589_v4  ;;  %v585_v9 = vld [vmem:[#allocation5 + $0x28] sm:$0xff]   ;;  %v592_v10 = vld [vmem:[#allocation7 + $0x18] sm:$0xff]   ;;  %v586_v11 = vld [vmem:[#allocation5 + $0x30] sm:$0xff]   ;;  %p698_p5 = scmp.lt.s32.totalorder %s441_s30, %s441_s30 }
  0x4d   :  { %511 = vmatprep.subr.bf16.mxu0 %v729_v0  ;;  %531 = vmatprep.subr.bf16.mxu1 %v729_v0  ;;  %v593_v12 = vld [vmem:[#allocation7 + $0x20] sm:$0xff]   ;;  %v587_v13 = vld [vmem:[#allocation5 + $0x38] sm:$0xff]   ;;  %v594_v14 = vld [vmem:[#allocation7 + $0x28] sm:$0xff]  }
  0x4e   :  { %v588_v15 = vld [vmem:[#allocation2] sm:$0xff]   ;;  %v595_v16 = vld [vmem:[#allocation7 + $0x30] sm:$0xff]   ;;  %v597_v18 = vld [vmem:[#allocation8] sm:$0xff]  }
  0x4f   :  { %v596_v17 = vld [vmem:[#allocation7 + $0x38] sm:$0xff]   ;;  %v598_v19 = vld [vmem:[#allocation8 + $0x8] sm:$0xff]   ;;  %v599_v20 = vld [vmem:[#allocation8 + $0x10] sm:$0xff]  }
  0x50   :  { %512 = vmatpush3.bf16.msra.mxu0 %v581_v2  ;;  %532 = vmatpush3.bf16.msra.mxu1 %v590_v6  ;;  %v600_v21 = vld [vmem:[#allocation8 + $0x18] sm:$0xff]   ;;  %v601_v22 = vld [vmem:[#allocation8 + $0x20] sm:$0xff]   ;;  %v602_v23 = vld [vmem:[#allocation8 + $0x28] sm:$0xff]  }
  0x51   :  { %513 = vmatprep.subr.bf16.mxu0 %v729_v0  ;;  %533 = vmatprep.subr.bf16.mxu1 %v729_v0  ;;  %v454_v24 = vld [vmem:[%s901_s2] ss:$0 sm:$0xff]  ;;  %v603_v34 = vld [vmem:[#allocation8 + $0x30] sm:$0xff]  }
  0x52   :  { %v604_v35 = vld [vmem:[#allocation8 + $0x38] sm:$0xff]  }
  0x53   :  { %v464_v36 = vld [vmem:[%s903_s4] ss:$0 sm:$0xff]  ;;  %s693_s4 = scalar_lea.vmem %s441_s30, 256 }
  0x54   :  { %514 = vmatpush3.bf16.msra.mxu0 %v582_v3  ;;  %534 = vmatpush3.bf16.msra.mxu1 %v591_v8  ;;  %v473_v46 = vld [vmem:[%s905_s6] ss:$0 sm:$0xff]  ;;  %p694_p4 = scmp.ne.s32.totalorder %s441_s30, %s693_s4  ;;  %p699_p6 = scmp.lt.s32.totalorder %s693_s4, %s693_s4 }
  0x55   :  { %515 = vmatprep.subr.bf16.mxu0 %v729_v0  ;;  %535 = vmatprep.subr.bf16.mxu1 %v729_v0 }
  0x56   :  { %p700_p7 = por %p699_p6, %p698_p5 }
  0x58   :  { %516 = vmatpush3.bf16.msra.mxu0 %v583_v5  ;;  %536 = vmatpush3.bf16.msra.mxu1 %v592_v10  ;;  %p701_p8 = pnand %p700_p7, %p694_p4 }
  0x59   :  { %517 = vmatprep.subr.bf16.mxu0 %v729_v0  ;;  %537 = vmatprep.subr.bf16.mxu1 %v729_v0 }
  0x5c   :  { %518 = vmatpush3.bf16.msra.mxu0 %v584_v7  ;;  %538 = vmatpush3.bf16.msra.mxu1 %v593_v12 }
  0x5d   :  { %519 = vmatprep.subr.bf16.mxu0 %v729_v0  ;;  %539 = vmatprep.subr.bf16.mxu1 %v729_v0 }
  0x60   :  { %520 = vmatpush3.bf16.msra.mxu0 %v585_v9  ;;  %540 = vmatpush3.bf16.msra.mxu1 %v594_v14 }
  0x61   :  { %521 = vmatprep.subr.bf16.mxu0 %v729_v0  ;;  %541 = vmatprep.subr.bf16.mxu1 %v729_v0 }
  0x64   :  { %522 = vmatpush3.bf16.msra.mxu0 %v586_v11  ;;  %542 = vmatpush3.bf16.msra.mxu1 %v595_v16 }
  0x65   :  { %523 = vmatprep.subr.bf16.mxu0 %v729_v0  ;;  %543 = vmatprep.subr.bf16.mxu1 %v729_v0 }
  0x68   :  { %524 = vmatpush3.bf16.msra.mxu0 %v587_v13  ;;  %544 = vmatpush3.bf16.msra.mxu1 %v596_v17 }
  0x69   :  { %549 = vmatprep.subr.bf16.mxu0 %v729_v0 }
  0x6b   :  { %526 = vmatmul.mubr.bf16.vlgmr.msra.gmra.mrb[0].mxu0 %v588_v15 }
  0x6c   :  { %565 = vmatprep.mubr.msk.bf16.mxu0 %vm730_vm0, %v729_v0  ;;  %550 = vmatpush3.bf16.msra.mxu0 %v597_v18 }
  0x6d   :  { %551 = vmatprep.subr.bf16.mxu0 %v729_v0 }
  0x70   :  { %552 = vmatpush3.bf16.msra.mxu0 %v598_v19 }
  0x71   :  { %553 = vmatprep.subr.bf16.mxu0 %v729_v0 }
  0x74   :  { %554 = vmatpush3.bf16.msra.mxu0 %v599_v20 }
  0x75   :  { %555 = vmatprep.subr.bf16.mxu0 %v729_v0 }
  0x78   :  { %556 = vmatpush3.bf16.msra.mxu0 %v600_v21 }
  0x79   :  { %557 = vmatprep.subr.bf16.mxu0 %v729_v0 }
  0x7c   :  { %558 = vmatpush3.bf16.msra.mxu0 %v601_v22 }
  0x7d   :  { %559 = vmatprep.subr.bf16.mxu0 %v729_v0 }
  0x80   :  { %560 = vmatpush3.bf16.msra.mxu0 %v602_v23 }
  0x81   :  { %561 = vmatprep.subr.bf16.mxu0 %v729_v0 }
  0x84   :  { %562 = vmatpush3.bf16.msra.mxu0 %v603_v34 }
  0x85   :  { %563 = vmatprep.subr.bf16.mxu0 %v729_v0 }
  0x88   :  { %564 = vmatpush3.bf16.msra.mxu0 %v604_v35 }
 0x13e   :  { %v196_v25 = vpop.f32.mrb[0].mxu0 }
 0x13f   :  { %v197_v26 = vadd.f32 %v454_v24, %v196_v25  ;;  %v527_v27 = vpop.f32.mrb[1].mxu0 }
 0x140   :  { %v199_v28 = vpop.f32.mrb[2].mxu0 }
 0x141   :  { %v200_v29 = vadd.f32 %v454_v24, %v199_v28  ;;  %v528_v30 = vpop.f32.mrb[3].mxu0  ;;  %v203_v31 = vmax.f32 %v197_v26, 0.0 }
 0x143   :  { %v204_v32 = vmax.f32 %v200_v29, 0.0 }
 0x145   :  { %v205_v33 = vpack.c.bf16 %v204_v32, %v203_v31 }
 0x147   :  { %546 = vmatmul.mubr.bf16.vlgmr.msra.gmra.mrb[0].mxu1 %v205_v33 }
 0x21a   :  { %v311_v37 = vpop.f32.mrb[0].mxu1 }
 0x21b   :  { %v312_v38 = vadd.f32 %v464_v36, %v311_v37  ;;  %v547_v39 = vpop.f32.mrb[1].mxu1 }
 0x21c   :  { %v314_v40 = vpop.f32.mrb[2].mxu1 }
 0x21d   :  { %v315_v41 = vadd.f32 %v464_v36, %v314_v40  ;;  %v548_v42 = vpop.f32.mrb[3].mxu1  ;;  %v318_v43 = vmax.f32 %v312_v38, 0.0 }
 0x21f   :  { %v319_v44 = vmax.f32 %v315_v41, 0.0 }
 0x221   :  { %v320_v45 = vpack.c.bf16 %v319_v44, %v318_v43 }
 0x223   :  { %566 = vmatmul.mubr.bf16.vlgmr.msra.gmra.mrb[4].mxu0 %v320_v45 }
 0x2f6   :  { %v426_v47 = vpop.f32.mrb[4].mxu0 }
 0x2f7   :  { %v427_v48 = vadd.f32 %v473_v46, %v426_v47  ;;  %v567_v49 = vpop.f32.mrb[5].mxu0 }
 0x2f8   :  { %v429_v50 = vpop.f32.mrb[6].mxu0 }
 0x2f9   :  { %433 = vst [vmem:[#allocation10] sm:$0xff] %v427_v48  ;;  %v430_v51 = vadd.f32 %v473_v46, %v429_v50  ;;  %v568_v52 = vpop.f32.mrb[7].mxu0 }
 0x2fb   :  { %434 = vst [vmem:[#allocation10 + $0x8] sm:$0xff] %v430_v51 }
 0x2fc   :  { %704 = shalt.err (!%p701_p8)
}
 0x2fd   :  { %s705_s9 = scalar_lea.hbm %s906_s7, 256 }
 0x2fe   :  { %p706_p9 = scmp.ne.s32.totalorder %s906_s7, %s705_s9  ;;  %p709_p10 = scmp.lt.u32.totalorder %s705_s9, %s906_s7 }
 0x300   :  { %p711_p11 = pnand %p709_p10, %p706_p9 }
 0x302   :  { %714 = shalt.err (!%p711_p11)
}
 0x303   :  { %s732_s16 = smov 128   ;;  %s733_s0 = smov 8  }
 0x304   :  { %446 = dma.vmem_to_hbm [thread:$0]  %s441_s30, 256, %s906_s7, [#allocation4], %s732_s16, %s732_s16, %s733_s0  }
 0x305   :  { %721 = dma.done.wait [#allocation4], 256  }
 0x306   :  { %722 = vsyncadd [#allocation4], 4294967040 }
 0x307   :  { %450 = vsyncpa [#allocation3], 1 }
 0x308   :  { %451 = vsyncpa [#allocation6], 1 }
 0x309   :  { %452 = vsyncpa [#allocation9], 1 }
 0x30a   :  { %453 = vsyncpa [#allocation4], 1 }

// kernel: tpu_custom_call.1
= control target key start
LH: loop header
LB: loop body
LE: loop exit
PB: predicated region body
PF: predicated region fallthrough
CT: control target
= control target key end

     0   :  { %12 = vsyncpa [#allocation3], 0  ;;  %s899_s0 = inlined_call_operand.hbm [shape: bf16[16,128], index: 0, kind: input, shape index: {}]   ;;  %s900_s1 = inlined_call_operand.hbm [shape: bf16[128,128], index: 1, kind: input, shape index: {}]   ;;  %s901_s2 = inlined_call_operand.vmem [shape: f32[1,128], index: 2, kind: input, shape index: {}]   ;;  %s902_s3 = inlined_call_operand.hbm [shape: bf16[128,128], index: 3, kind: input, shape index: {}]   ;;  %s903_s4 = inlined_call_operand.vmem [shape: f32[1,128], index: 4, kind: input, shape index: {}]   ;;  %s904_s5 = inlined_call_operand.hbm [shape: bf16[128,128], index: 5, kind: input, shape index: {}]   ;;  %s905_s6 = inlined_call_operand.vmem [shape: f32[1,128], index: 6, kind: input, shape index: {}]   ;;  %s906_s7 = inlined_call_operand.hbm [shape: f32[16,128], index: 7, kind: output, shape index: {}]  }
   0x1   :  { %13 = vsyncpa [#allocation6], 0 }
   0x2   :  { %14 = vsyncpa [#allocation9], 0 }
   0x3   :  { %15 = vsyncpa [#allocation4], 0  ;;  %s723_s24 = smov [#allocation5]   ;;  %s724_s26 = smov [#allocation2]  }
   0x4   :  { %s33_s25 = sshll.u32 %s723_s24, 4  ;;  %s21_s27 = sshll.u32 %s724_s26, 4  ;;  %s34_s25 = int_to_ptr.vmem [resolvable:$true] %s33_s25  ;;  %s774_s27 = int_to_ptr.vmem [resolvable:$true] %s21_s27 }
   0x5   :  { %s605_s30 = scalar_lea.hbm %s900_s1, 1024 }
   0x6   :  { %p606_p0 = scmp.ne.s32.totalorder %s900_s1, %s605_s30  ;;  %p609_p1 = scmp.lt.u32.totalorder %s605_s30, %s900_s1 }
   0x8   :  { %p611_p2 = pnand %p609_p1, %p606_p0 }
   0xa   :  { %614 = shalt.err (!%p611_p2)
}
   0xb   :  { %s615_s12 = scalar_lea.vmem %s34_s25, 1024  ;;  %p620_p4 = scmp.lt.s32.totalorder %s34_s25, %s34_s25 }
   0xc   :  { %p616_p3 = scmp.ne.s32.totalorder %s34_s25, %s615_s12  ;;  %p621_p5 = scmp.lt.s32.totalorder %s615_s12, %s615_s12 }
   0xe   :  { %p622_p6 = por %p621_p5, %p620_p4 }
  0x10   :  { %p623_p7 = pnand %p622_p6, %p616_p3 }
  0x12   :  { %626 = shalt.err (!%p623_p7)
}
  0x13   :  { %s725_s13 = smov 64   ;;  %s726_s14 = smov 4  }
  0x14   :  { %39 = dma.hbm_to_vmem [thread:$0]  %s900_s1, 1024, %s34_s25, [#allocation6], %s725_s13, %s725_s13, %s726_s14  }
  0x15   :  { %s627_s19 = scalar_lea.hbm %s899_s0, 128 }
  0x16   :  { %p628_p8 = scmp.ne.s32.totalorder %s899_s0, %s627_s19  ;;  %p631_p9 = scmp.lt.u32.totalorder %s627_s19, %s899_s0 }
  0x18   :  { %p633_p10 = pnand %p631_p9, %p628_p8 }
  0x1a   :  { %636 = shalt.err (!%p633_p10)
}
  0x1b   :  { %s637_s24 = scalar_lea.vmem %s774_s27, 128  ;;  %p642_p12 = scmp.lt.s32.totalorder %s774_s27, %s774_s27 }
  0x1c   :  { %p638_p11 = scmp.ne.s32.totalorder %s774_s27, %s637_s24  ;;  %p643_p13 = scmp.lt.s32.totalorder %s637_s24, %s637_s24 }
  0x1e   :  { %p644_p0 = por %p643_p13, %p642_p12 }
  0x20   :  { %p645_p1 = pnand %p644_p0, %p638_p11 }
  0x22   :  { %648 = shalt.err (!%p645_p1)
}
  0x23   :  { %27 = dma.hbm_to_vmem [thread:$0]  %s899_s0, 128, %s774_s27, [#allocation3], %s725_s13, %s725_s13, %s726_s14  }
  0x24   :  { %s727_s26 = smov [#allocation7]   ;;  %s728_s29 = smov [#allocation8]  }
  0x25   :  { %s47_s28 = sshll.u32 %s727_s26, 4  ;;  %s61_s30 = sshll.u32 %s728_s29, 4  ;;  %s48_s28 = int_to_ptr.vmem [resolvable:$true] %s47_s28  ;;  %s811_s30 = int_to_ptr.vmem [resolvable:$true] %s61_s30 }
  0x26   :  { %s649_s10 = scalar_lea.hbm %s902_s3, 1024 }
  0x27   :  { %p650_p2 = scmp.ne.s32.totalorder %s902_s3, %s649_s10  ;;  %p653_p3 = scmp.lt.u32.totalorder %s649_s10, %s902_s3 }
  0x29   :  { %p655_p4 = pnand %p653_p3, %p650_p2 }
  0x2b   :  { %658 = shalt.err (!%p655_p4)
}
  0x2c   :  { %s659_s0 = scalar_lea.vmem %s48_s28, 1024  ;;  %p664_p6 = scmp.lt.s32.totalorder %s48_s28, %s48_s28 }
  0x2d   :  { %p660_p5 = scmp.ne.s32.totalorder %s48_s28, %s659_s0  ;;  %p665_p7 = scmp.lt.s32.totalorder %s659_s0, %s659_s0 }
  0x2f   :  { %p666_p8 = por %p665_p7, %p664_p6 }
  0x31   :  { %p667_p9 = pnand %p666_p8, %p660_p5 }
  0x33   :  { %670 = shalt.err (!%p667_p9)
}
  0x34   :  { %53 = dma.hbm_to_vmem [thread:$0]  %s902_s3, 1024, %s48_s28, [#allocation6], %s725_s13, %s725_s13, %s726_s14  }
  0x35   :  { %s671_s20 = scalar_lea.hbm %s904_s5, 1024 }
  0x36   :  { %p672_p10 = scmp.ne.s32.totalorder %s904_s5, %s671_s20  ;;  %p675_p11 = scmp.lt.u32.totalorder %s671_s20, %s904_s5 }
  0x38   :  { %p677_p12 = pnand %p675_p11, %p672_p10 }
  0x3a   :  { %680 = shalt.err (!%p677_p12)
}
  0x3b   :  { %s681_s1 = scalar_lea.vmem %s811_s30, 1024  ;;  %p686_p0 = scmp.lt.s32.totalorder %s811_s30, %s811_s30 }
  0x3c   :  { %p682_p13 = scmp.ne.s32.totalorder %s811_s30, %s681_s1  ;;  %p687_p1 = scmp.lt.s32.totalorder %s681_s1, %s681_s1 }
  0x3e   :  { %p688_p2 = por %p687_p1, %p686_p0 }
  0x40   :  { %p689_p3 = pnand %p688_p2, %p682_p13 }
  0x42   :  { %692 = shalt.err (!%p689_p3)
}
  0x43   :  { %67 = dma.hbm_to_vmem [thread:$0]  %s904_s5, 1024, %s811_s30, [#allocation9], %s725_s13, %s725_s13, %s726_s14  }
  0x44   :  { %715 = dma.done.wait [#allocation3], 128  }
  0x45   :  { %716 = vsyncadd [#allocation3], 4294967168 }
  0x46   :  { %717 = dma.done.wait [#allocation6], 2048  }
  0x47   :  { %718 = vsyncadd [#allocation6], 4294965248 }
  0x48   :  { %719 = dma.done.wait [#allocation9], 1024  }
  0x49   :  { %720 = vsyncadd [#allocation9], 4294966272  ;;  %v729_v0 = vmov 0.0   ;;  %vm730_vm0 = vmmov 0   ;;  %v580_v1 = vld [vmem:[#allocation5] sm:$0xff]   ;;  %v581_v2 = vld [vmem:[#allocation5 + $0x8] sm:$0xff]  }
  0x4a   :  { %509 = vmatprep.subr.bf16.mxu0 %v729_v0  ;;  %525 = vmatprep.mubr.msk.bf16.mxu0 %vm730_vm0, %v729_v0  ;;  %v582_v3 = vld [vmem:[#allocation5 + $0x10] sm:$0xff]   ;;  %v589_v4 = vld [vmem:[#allocation7] sm:$0xff]   ;;  %v583_v5 = vld [vmem:[#allocation5 + $0x18] sm:$0xff]   ;;  %s731_s29 = smov [#allocation10]  }
  0x4b   :  { %529 = vmatprep.subr.bf16.mxu1 %v729_v0  ;;  %545 = vmatprep.mubr.msk.bf16.mxu1 %vm730_vm0, %v729_v0  ;;  %v590_v6 = vld [vmem:[#allocation7 + $0x8] sm:$0xff]   ;;  %v584_v7 = vld [vmem:[#allocation5 + $0x20] sm:$0xff]   ;;  %v591_v8 = vld [vmem:[#allocation7 + $0x10] sm:$0xff]   ;;  %s440_s30 = sshll.u32 %s731_s29, 4  ;;  %s441_s30 = int_to_ptr.vmem [resolvable:$true] %s440_s30 }
  0x4c   :  { %510 = vmatpush3.bf16.msra.mxu0 %v580_v1  ;;  %530 = vmatpush3.bf16.msra.mxu1 %v589_v4  ;;  %v585_v9 = vld [vmem:[#allocation5 + $0x28] sm:$0xff]   ;;  %v592_v10 = vld [vmem:[#allocation7 + $0x18] sm:$0xff]   ;;  %v586_v11 = vld [vmem:[#allocation5 + $0x30] sm:$0xff]   ;;  %p698_p5 = scmp.lt.s32.totalorder %s441_s30, %s441_s30 }
  0x4d   :  { %511 = vmatprep.subr.bf16.mxu0 %v729_v0  ;;  %531 = vmatprep.subr.bf16.mxu1 %v729_v0  ;;  %v593_v12 = vld [vmem:[#allocation7 + $0x20] sm:$0xff]   ;;  %v587_v13 = vld [vmem:[#allocation5 + $0x38] sm:$0xff]   ;;  %v594_v14 = vld [vmem:[#allocation7 + $0x28] sm:$0xff]  }
  0x4e   :  { %v588_v15 = vld [vmem:[#allocation2] sm:$0xff]   ;;  %v595_v16 = vld [vmem:[#allocation7 + $0x30] sm:$0xff]   ;;  %v597_v18 = vld [vmem:[#allocation8] sm:$0xff]  }
  0x4f   :  { %v596_v17 = vld [vmem:[#allocation7 + $0x38] sm:$0xff]   ;;  %v598_v19 = vld [vmem:[#allocation8 + $0x8] sm:$0xff]   ;;  %v599_v20 = vld [vmem:[#allocation8 + $0x10] sm:$0xff]  }
  0x50   :  { %512 = vmatpush3.bf16.msra.mxu0 %v581_v2  ;;  %532 = vmatpush3.bf16.msra.mxu1 %v590_v6  ;;  %v600_v21 = vld [vmem:[#allocation8 + $0x18] sm:$0xff]   ;;  %v601_v22 = vld [vmem:[#allocation8 + $0x20] sm:$0xff]   ;;  %v602_v23 = vld [vmem:[#allocation8 + $0x28] sm:$0xff]  }
  0x51   :  { %513 = vmatprep.subr.bf16.mxu0 %v729_v0  ;;  %533 = vmatprep.subr.bf16.mxu1 %v729_v0  ;;  %v454_v24 = vld [vmem:[%s901_s2] ss:$0 sm:$0xff]  ;;  %v603_v34 = vld [vmem:[#allocation8 + $0x30] sm:$0xff]  }
  0x52   :  { %v604_v35 = vld [vmem:[#allocation8 + $0x38] sm:$0xff]  }
  0x53   :  { %v464_v36 = vld [vmem:[%s903_s4] ss:$0 sm:$0xff]  ;;  %s693_s4 = scalar_lea.vmem %s441_s30, 256 }
  0x54   :  { %514 = vmatpush3.bf16.msra.mxu0 %v582_v3  ;;  %534 = vmatpush3.bf16.msra.mxu1 %v591_v8  ;;  %v473_v46 = vld [vmem:[%s905_s6] ss:$0 sm:$0xff]  ;;  %p694_p4 = scmp.ne.s32.totalorder %s441_s30, %s693_s4  ;;  %p699_p6 = scmp.lt.s32.totalorder %s693_s4, %s693_s4 }
  0x55   :  { %515 = vmatprep.subr.bf16.mxu0 %v729_v0  ;;  %535 = vmatprep.subr.bf16.mxu1 %v729_v0 }
  0x56   :  { %p700_p7 = por %p699_p6, %p698_p5 }
  0x58   :  { %516 = vmatpush3.bf16.msra.mxu0 %v583_v5  ;;  %536 = vmatpush3.bf16.msra.mxu1 %v592_v10  ;;  %p701_p8 = pnand %p700_p7, %p694_p4 }
  0x59   :  { %517 = vmatprep.subr.bf16.mxu0 %v729_v0  ;;  %537 = vmatprep.subr.bf16.mxu1 %v729_v0 }
  0x5c   :  { %518 = vmatpush3.bf16.msra.mxu0 %v584_v7  ;;  %538 = vmatpush3.bf16.msra.mxu1 %v593_v12 }
  0x5d   :  { %519 = vmatprep.subr.bf16.mxu0 %v729_v0  ;;  %539 = vmatprep.subr.bf16.mxu1 %v729_v0 }
  0x60   :  { %520 = vmatpush3.bf16.msra.mxu0 %v585_v9  ;;  %540 = vmatpush3.bf16.msra.mxu1 %v594_v14 }
  0x61   :  { %521 = vmatprep.subr.bf16.mxu0 %v729_v0  ;;  %541 = vmatprep.subr.bf16.mxu1 %v729_v0 }
  0x64   :  { %522 = vmatpush3.bf16.msra.mxu0 %v586_v11  ;;  %542 = vmatpush3.bf16.msra.mxu1 %v595_v16 }
  0x65   :  { %523 = vmatprep.subr.bf16.mxu0 %v729_v0  ;;  %543 = vmatprep.subr.bf16.mxu1 %v729_v0 }
  0x68   :  { %524 = vmatpush3.bf16.msra.mxu0 %v587_v13  ;;  %544 = vmatpush3.bf16.msra.mxu1 %v596_v17 }
  0x69   :  { %549 = vmatprep.subr.bf16.mxu0 %v729_v0 }
  0x6b   :  { %526 = vmatmul.mubr.bf16.vlgmr.msra.gmra.mrb[0].mxu0 %v588_v15 }
  0x6c   :  { %565 = vmatprep.mubr.msk.bf16.mxu0 %vm730_vm0, %v729_v0  ;;  %550 = vmatpush3.bf16.msra.mxu0 %v597_v18 }
  0x6d   :  { %551 = vmatprep.subr.bf16.mxu0 %v729_v0 }
  0x70   :  { %552 = vmatpush3.bf16.msra.mxu0 %v598_v19 }
  0x71   :  { %553 = vmatprep.subr.bf16.mxu0 %v729_v0 }
  0x74   :  { %554 = vmatpush3.bf16.msra.mxu0 %v599_v20 }
  0x75   :  { %555 = vmatprep.subr.bf16.mxu0 %v729_v0 }
  0x78   :  { %556 = vmatpush3.bf16.msra.mxu0 %v600_v21 }
  0x79   :  { %557 = vmatprep.subr.bf16.mxu0 %v729_v0 }
  0x7c   :  { %558 = vmatpush3.bf16.msra.mxu0 %v601_v22 }
  0x7d   :  { %559 = vmatprep.subr.bf16.mxu0 %v729_v0 }
  0x80   :  { %560 = vmatpush3.bf16.msra.mxu0 %v602_v23 }
  0x81   :  { %561 = vmatprep.subr.bf16.mxu0 %v729_v0 }
  0x84   :  { %562 = vmatpush3.bf16.msra.mxu0 %v603_v34 }
  0x85   :  { %563 = vmatprep.subr.bf16.mxu0 %v729_v0 }
  0x88   :  { %564 = vmatpush3.bf16.msra.mxu0 %v604_v35 }
 0x13e   :  { %v196_v25 = vpop.f32.mrb[0].mxu0 }
 0x13f   :  { %v197_v26 = vadd.f32 %v454_v24, %v196_v25  ;;  %v527_v27 = vpop.f32.mrb[1].mxu0 }
 0x140   :  { %v199_v28 = vpop.f32.mrb[2].mxu0 }
 0x141   :  { %v200_v29 = vadd.f32 %v454_v24, %v199_v28  ;;  %v528_v30 = vpop.f32.mrb[3].mxu0  ;;  %v203_v31 = vmax.f32 %v197_v26, 0.0 }
 0x143   :  { %v204_v32 = vmax.f32 %v200_v29, 0.0 }
 0x145   :  { %v205_v33 = vpack.c.bf16 %v204_v32, %v203_v31 }
 0x147   :  { %546 = vmatmul.mubr.bf16.vlgmr.msra.gmra.mrb[0].mxu1 %v205_v33 }
 0x21a   :  { %v311_v37 = vpop.f32.mrb[0].mxu1 }
 0x21b   :  { %v312_v38 = vadd.f32 %v464_v36, %v311_v37  ;;  %v547_v39 = vpop.f32.mrb[1].mxu1 }
 0x21c   :  { %v314_v40 = vpop.f32.mrb[2].mxu1 }
 0x21d   :  { %v315_v41 = vadd.f32 %v464_v36, %v314_v40  ;;  %v548_v42 = vpop.f32.mrb[3].mxu1  ;;  %v318_v43 = vmax.f32 %v312_v38, 0.0 }
 0x21f   :  { %v319_v44 = vmax.f32 %v315_v41, 0.0 }
 0x221   :  { %v320_v45 = vpack.c.bf16 %v319_v44, %v318_v43 }
 0x223   :  { %566 = vmatmul.mubr.bf16.vlgmr.msra.gmra.mrb[4].mxu0 %v320_v45 }
 0x2f6   :  { %v426_v47 = vpop.f32.mrb[4].mxu0 }
 0x2f7   :  { %v427_v48 = vadd.f32 %v473_v46, %v426_v47  ;;  %v567_v49 = vpop.f32.mrb[5].mxu0 }
 0x2f8   :  { %v429_v50 = vpop.f32.mrb[6].mxu0 }
 0x2f9   :  { %433 = vst [vmem:[#allocation10] sm:$0xff] %v427_v48  ;;  %v430_v51 = vadd.f32 %v473_v46, %v429_v50  ;;  %v568_v52 = vpop.f32.mrb[7].mxu0 }
 0x2fb   :  { %434 = vst [vmem:[#allocation10 + $0x8] sm:$0xff] %v430_v51 }
 0x2fc   :  { %704 = shalt.err (!%p701_p8)
}
 0x2fd   :  { %s705_s9 = scalar_lea.hbm %s906_s7, 256 }
 0x2fe   :  { %p706_p9 = scmp.ne.s32.totalorder %s906_s7, %s705_s9  ;;  %p709_p10 = scmp.lt.u32.totalorder %s705_s9, %s906_s7 }
 0x300   :  { %p711_p11 = pnand %p709_p10, %p706_p9 }
 0x302   :  { %714 = shalt.err (!%p711_p11)
}
 0x303   :  { %s732_s16 = smov 128   ;;  %s733_s0 = smov 8  }
 0x304   :  { %446 = dma.vmem_to_hbm [thread:$0]  %s441_s30, 256, %s906_s7, [#allocation4], %s732_s16, %s732_s16, %s733_s0  }
 0x305   :  { %721 = dma.done.wait [#allocation4], 256  }
 0x306   :  { %722 = vsyncadd [#allocation4], 4294967040 }
 0x307   :  { %450 = vsyncpa [#allocation3], 1 }
 0x308   :  { %451 = vsyncpa [#allocation6], 1 }
 0x309   :  { %452 = vsyncpa [#allocation9], 1 }
 0x30a   :  { %453 = vsyncpa [#allocation4], 1 }

</bundles_post_ra>
